<compile_context>
chip_gen: v7x
topology: tpu7x:2x2x1
jax: 0.10.0
libtpu: 0.0.40
codegen_flags: <defaults>
</compile_context>

<pallas_src>
import functools

import jax
import jax.numpy as jnp
from jax.experimental import pallas as pl
from jax.experimental.pallas import tpu as pltpu


# ---------------------------------------------------------------------------
# Static (trace-time) tile selection helpers
# ---------------------------------------------------------------------------
def _round_up(x, m):
    return ((x + m - 1) // m) * m


def _vmem_budgets():
    """(block byte budget, vmem_limit_bytes) sized to the local device."""
    try:
        cap = int(pltpu.get_tpu_info().vmem_capacity_bytes)
    except Exception:
        cap = 64 << 20  # conservative default (v7x per-core VMEM)
    if cap <= (64 << 20):
        # v7x-class 64 MiB parts: leave headroom for Mosaic internal scratch.
        block_budget = int(cap * 0.40)
        vmem_limit = int(cap * 0.70)
    else:
        # 128 MiB parts (v5e / v6e).
        block_budget = min(int(cap * 0.50), 48 << 20)
        vmem_limit = min(int(cap * 0.75), 96 << 20)
    return block_budget, vmem_limit


def _choose_b_tiling(B):
    """Batch tiling: untiled for small B, 256-row parallel tiles otherwise."""
    if B <= 512:
        return B, B, 1              # B_pad, tb, n_b
    tb = 256
    B_pad = _round_up(B, tb)
    return B_pad, tb, B_pad // tb


def _choose_e_tiling(E):
    """Lane-dense E tiles; >= 2 tiles when E_pad >= 256 (v7x megacore), te <= 1024."""
    E_pad = _round_up(max(E, 128), 128)
    lanes = E_pad // 128
    if lanes == 1:
        return E_pad, E_pad, 1      # E_pad, te, n_e
    n_e = lanes                     # fallback: 128-wide tiles
    for cand in range(2, lanes + 1):
        if lanes % cand == 0 and (lanes // cand) * 128 <= 1024:
            n_e = cand
            break
    te = (lanes // n_e) * 128
    return E_pad, te, n_e


def _choose_k_tiling(F, te, tb, block_budget):
    """K (reduction) tiling: keep >= 2-4 steps for pipelining, bounded by VMEM."""
    F_pad = _round_up(max(F, 128), 128)
    m = F_pad // 128
    n_k_min = min(4, m)             # never collapse to a single un-pipelined step

    # VMEM accounting: 2 output buffers + bias (f32), double-buffered f32
    # activation tile and bf16 weight tile per K element.
    out_bytes = 2 * tb * te * 4 + 2 * te * 4
    bytes_per_k = 2 * (tb * 4 + te * 2)
    tk_budget = max(128, (max(0, block_budget - out_bytes) // bytes_per_k) // 128 * 128)
    tk_weight = max(128, ((4 << 20) // (te * 2)) // 128 * 128)  # <= ~4 MiB / weight buf
    tk_max = min(tk_budget, tk_weight, 2048)

    # Largest tk = 128*d with d | m, tk <= tk_max, and at least n_k_min steps.
    best_d = 1
    for d in range(1, m + 1):
        if m % d == 0 and 128 * d <= tk_max and (m // d) >= n_k_min:
            best_d = d
    tk = 128 * best_d
    n_k = m // best_d
    return F_pad, tk, n_k


# ---------------------------------------------------------------------------
# Kernel
# ---------------------------------------------------------------------------
def _fc_kernel(h_ref, w_ref, b_ref, o_ref):
    """One (B-tile, E-tile, K-tile) grid step of z = h @ w_t + b.

    Grid axes 0/1 tile the batch and embedding dims (independent ->
    "parallel", lets v7x shard across its two TensorCores); axis 2 tiles the
    reduction dim F ("arbitrary", last).  The f32 output block is
    VMEM-resident across the reduction axis and doubles as the accumulator:
    seeded with the bias at k == 0, accumulated on every K step.  The weight
    arrives pre-transposed as (tk, te), so the MXU is fed in its native (K, N)
    orientation with no in-kernel layout change.
    """
    k = pl.program_id(2)

    @pl.when(k == 0)
    def _init():
        o_ref[...] = jnp.broadcast_to(b_ref[...], o_ref.shape)

    o_ref[...] += jnp.dot(
        h_ref[...].astype(jnp.bfloat16),   # f32 stream, bf16 MXU operand
        w_ref[...],                        # (tk, te) bf16, native orientation
        preferred_element_type=jnp.float32,
    )


# ---------------------------------------------------------------------------
# Wrappers
# ---------------------------------------------------------------------------
def prepare_fc_params(w_fc, b_fc):
    """One-time parameter prep — call OUTSIDE the training/inference step.

    Transposes the nn.Linear weight to (F, E), casts to bf16 and zero-pads
    both dims up to multiples of 128, so the hot forward path streams the
    weight from HBM exactly once per call with no per-call transpose / cast /
    pad copies and the kernel's output tiles are lane-dense.

    Returns (w_t, b, embedding_dim):
      w_t : (F_pad, E_pad) bf16
      b   : (1, E_pad)     f32
      embedding_dim : true E (keep it — nce_forward requires it so padded
                      params can never silently yield an (B, E_pad) result).
    """
    E, F = w_fc.shape
    E_pad = _round_up(max(E, 128), 128)
    F_pad = _round_up(max(F, 128), 128)
    w_t = jnp.pad(w_fc.astype(jnp.bfloat16).T, ((0, F_pad - F), (0, E_pad - E)))
    b = jnp.pad(b_fc.astype(jnp.float32), (0, E_pad - E)).reshape(1, E_pad)
    return w_t, b, E


@functools.partial(jax.jit, static_argnames=("embedding_dim",))
def nce_forward(x, w_t, b, *, embedding_dim):
    """NCE.forward / NCE.encode with the default identity encoder.

    x   : (B, C, H, W) float32        observations (NCHW, like PyTorch)
    w_t : (F_pad, E_pad) bfloat16     from prepare_fc_params (F = C*H*W)
    b   : (1, E_pad) float32          from prepare_fc_params
    returns z : (B, embedding_dim) float32
    """
    assert embedding_dim is not None, "embedding_dim is required (padded params)"
    B = x.shape[0]
    F = 1
    for d in x.shape[1:]:
        F *= d
    E = int(embedding_dim)

    F_pad_min = _round_up(max(F, 128), 128)
    E_pad = int(w_t.shape[1])
    assert w_t.shape[0] == F_pad_min, "weight fan-in must match flattened obs (prepared)"
    assert b.shape == (1, E_pad)
    assert E <= E_pad and _round_up(max(E, 128), 128) == E_pad

    block_budget, vmem_limit = _vmem_budgets()
    B_pad, tb, n_b = _choose_b_tiling(B)
    E_pad2, te, n_e = _choose_e_tiling(E)
    assert E_pad2 == E_pad
    F_pad, tk, n_k = _choose_k_tiling(F, te, tb, block_budget)
    assert F_pad == F_pad_min

    # Activations: flatten (row-major == torch.flatten(start_dim=1)).  Kept in
    # f32 (cast to bf16 happens inside the kernel), so no materialized bf16
    # copy; padding only when shapes are not tile-aligned.
    h = x.reshape(B, F)
    if F_pad != F or B_pad != B:
        h = jnp.pad(h, ((0, B_pad - B), (0, F_pad - F)))

    grid = (n_b, n_e, n_k)  # (parallel B tiles, parallel E tiles, reduction last)

    z_pad = pl.pallas_call(
        _fc_kernel,
        out_shape=jax.ShapeDtypeStruct((B_pad, E_pad), jnp.float32),
        grid_spec=pltpu.PrefetchScalarGridSpec(
            num_scalar_prefetch=0,
            grid=grid,
            in_specs=[
                pl.BlockSpec((tb, tk), lambda bi, j, k: (bi, k)),   # activation tile (f32)
                pl.BlockSpec((tk, te), lambda bi, j, k: (k, j)),    # weight tile (F,E) layout
                pl.BlockSpec((1, te), lambda bi, j, k: (0, j)),     # bias tile
            ],
            out_specs=pl.BlockSpec((tb, te), lambda bi, j, k: (bi, j)),
        ),
        compiler_params=pltpu.CompilerParams(
            dimension_semantics=("parallel", "parallel", "arbitrary"),
            vmem_limit_bytes=vmem_limit,
        ),
    )(h, w_t, b)

    return z_pad[:B, :E]


def _init_linear_params(key, out_features, in_features, dtype=jnp.float32):
    """Deterministic init mimicking nn.Linear.reset_parameters (U(+-1/sqrt(fan_in)))."""
    kw, kb = jax.random.split(key)
    bound = 1.0 / (in_features ** 0.5)
    w = jax.random.uniform(kw, (out_features, in_features), dtype, -bound, bound)
    b = jax.random.uniform(kb, (out_features,), dtype, -bound, bound)
    return w, b


if __name__ == "__main__":
    # Small shapes consistent with the module: obs_space.shape = (C, H, W).
    B, C, H, W = 2, 4, 16, 16
    EMBEDDING_DIM = 64
    N_FLATTEN = C * H * W  # 1024 (identity encoder -> conv_output_shape == obs shape)

    key = jax.random.PRNGKey(0)
    kx, kp = jax.random.split(key)

    x = jax.random.normal(kx, (B, C, H, W), dtype=jnp.float32)
    w_fc, b_fc = _init_linear_params(kp, EMBEDDING_DIM, N_FLATTEN)

    # TODO(synk): projection_head / bilinear W / aug / optimizer / target nets
    # exist in __init__ but are not used by forward(); only encode() is here.

    # One-time prep (transpose + bf16 cast + lane padding) outside the hot path.
    w_prep, b_prep, true_e = prepare_fc_params(w_fc, b_fc)
    assert true_e == EMBEDDING_DIM

    z = nce_forward(x, w_prep, b_prep, embedding_dim=EMBEDDING_DIM)
    z = jax.block_until_ready(z)

    # References.
    h32 = x.reshape(B, -1)
    z_ref_f32 = h32 @ w_fc.T + b_fc                           # exact f32 semantics
    h_bf = h32.astype(jnp.bfloat16).astype(jnp.float32)
    w_bf = w_fc.astype(jnp.bfloat16).astype(jnp.float32)
    z_ref_bf = h_bf @ w_bf.T + b_fc                           # kernel-precision ref

    assert z.shape == (B, EMBEDDING_DIM)
    assert jnp.allclose(z, z_ref_bf, atol=2e-3, rtol=2e-3), "mismatch vs bf16 ref"
    assert jnp.allclose(z, z_ref_f32, atol=5e-2, rtol=5e-2), "mismatch vs f32 ref"

    print("KERNEL_OK")
</pallas_src>

<mosaic_0001>
module attributes {stable_mosaic.version = 11 : i64} {
  func.func @_fc_kernel(%arg0: i32, %arg1: i32, %arg2: i32, %arg3: memref<2x256xf32, #tpu.memory_space<vmem>>, %arg4: memref<256x128xbf16, #tpu.memory_space<vmem>>, %arg5: memref<1x128xf32, #tpu.memory_space<vmem>>, %arg6: memref<2x128xf32, #tpu.memory_space<vmem>>) attributes {dimension_semantics = [#tpu.dimension_semantics<parallel>, #tpu.dimension_semantics<parallel>, #tpu.dimension_semantics<arbitrary>], iteration_bounds = array<i64: 1, 1, 4>, scalar_prefetch = 0 : i64, scratch_operands = 0 : i64, tpu.core_type = #tpu.core_type<tc>, window_params = [{transform_indices = @transform_0, window_bounds = array<i64: 2, 256>}, {transform_indices = @transform_1, window_bounds = array<i64: 256, 128>}, {transform_indices = @transform_2, window_bounds = array<i64: 1, 128>}, {transform_indices = @transform_3, window_bounds = array<i64: 2, 128>}]} {
    %c0_i32 = arith.constant 0 : i32
    %0 = arith.cmpi eq, %arg2, %c0_i32 : i32
    %1 = arith.extui %0 : i1 to i32
    %c0_i32_0 = arith.constant 0 : i32
    %2 = arith.cmpi ne, %1, %c0_i32_0 : i32
    scf.if %2 {
      %c0_8 = arith.constant 0 : index
      %c0_9 = arith.constant 0 : index
      %10 = vector.load %arg5[%c0_8, %c0_9] : memref<1x128xf32, #tpu.memory_space<vmem>>, vector<1x128xf32>
      %11 = vector.shape_cast %10 : vector<1x128xf32> to vector<1x128xf32>
      %12 = vector.broadcast %11 : vector<1x128xf32> to vector<2x128xf32>
      %c0_10 = arith.constant 0 : index
      %c0_11 = arith.constant 0 : index
      %13 = vector.load %arg6[%c0_10, %c0_11] : memref<2x128xf32, #tpu.memory_space<vmem>>, vector<2x128xf32>
      tpu.vector_store %arg6[%c0_10, %c0_11], %12 {strides = array<i32>} : memref<2x128xf32, #tpu.memory_space<vmem>>, vector<2x128xf32>,
    } else {
    }
    %c0 = arith.constant 0 : index
    %c0_1 = arith.constant 0 : index
    %3 = vector.load %arg6[%c0, %c0_1] : memref<2x128xf32, #tpu.memory_space<vmem>>, vector<2x128xf32>
    %c0_2 = arith.constant 0 : index
    %c0_3 = arith.constant 0 : index
    %4 = vector.load %arg3[%c0_2, %c0_3] : memref<2x256xf32, #tpu.memory_space<vmem>>, vector<2x256xf32>
    %5 = arith.truncf %4 : vector<2x256xf32> to vector<2x256xbf16>
    %c0_4 = arith.constant 0 : index
    %c0_5 = arith.constant 0 : index
    %6 = vector.load %arg4[%c0_4, %c0_5] : memref<256x128xbf16, #tpu.memory_space<vmem>>, vector<256x128xbf16>
    %cst = arith.constant dense<0.000000e+00> : vector<2x128xf32>
    %7 = tpu.matmul %5, %6, %cst {dimension_numbers = #tpu.dot_dimension_numbers<[1], [0], [0], [1], [0, 0, 1, 1], [], []>} : vector<2x256xbf16>, vector<256x128xbf16>, vector<2x128xf32> -> vector<2x128xf32>
    %8 = arith.addf %3, %7 : vector<2x128xf32>
    %c0_6 = arith.constant 0 : index
    %c0_7 = arith.constant 0 : index
    %9 = vector.load %arg6[%c0_6, %c0_7] : memref<2x128xf32, #tpu.memory_space<vmem>>, vector<2x128xf32>
    tpu.vector_store %arg6[%c0_6, %c0_7], %8 {strides = array<i32>} : memref<2x128xf32, #tpu.memory_space<vmem>>, vector<2x128xf32>,
    return
  }
  func.func @transform_0(%arg0: i32, %arg1: i32, %arg2: i32) -> (i32, i32) {
    %c0_i32 = arith.constant 0 : i32
    return %arg0, %arg2 : i32, i32
  }
  func.func @transform_1(%arg0: i32, %arg1: i32, %arg2: i32) -> (i32, i32) {
    %c0_i32 = arith.constant 0 : i32
    return %arg2, %arg1 : i32, i32
  }
  func.func @transform_2(%arg0: i32, %arg1: i32, %arg2: i32) -> (i32, i32) {
    %c0_i32 = arith.constant 0 : i32
    %c0_i32_0 = arith.constant 0 : i32
    return %c0_i32, %arg1 : i32, i32
  }
  func.func @transform_3(%arg0: i32, %arg1: i32, %arg2: i32) -> (i32, i32) {
    %c0_i32 = arith.constant 0 : i32
    return %arg0, %arg1 : i32, i32
  }
}

</mosaic_0001>

<bundles_post_ra>
// kernel: nce_forward.1
= control target key start
LH: loop header
LB: loop body
LE: loop exit
PB: predicated region body
PF: predicated region fallthrough
CT: control target
= control target key end

     0   :  { %8 = vsyncpa [#allocation3], 0  ;;  %s1010_s0 = inlined_call_operand.vmem [shape: f32[2,1024], index: 0, kind: input, shape index: {}]   ;;  %s1011_s1 = inlined_call_operand.hbm [shape: bf16[1024,128], index: 1, kind: input, shape index: {}]   ;;  %s1012_s2 = inlined_call_operand.vmem [shape: f32[1,128], index: 2, kind: input, shape index: {}]   ;;  %s1013_s3 = inlined_call_operand.hbm [shape: f32[2,128], index: 3, kind: output, shape index: {}]  }
   0x1   :  { %10 = vsyncpa [#allocation3 + $0x1], 0 }
   0x2   :  { %11 = vsyncpa [#allocation4], 0  ;;  %s835_s12 = smov 0   ;;  %s837_s13 = smov 0  }
   0x3   :  { %s839_s14 = smov 0   ;;  %s841_s15 = smov 0  }
   0x4   :  { %s843_s16 = smov 0   ;;  %s845_s17 = smov 0  }
   0x5 LB: > { %s562_s18 = sadd.s32 4294967295, %s809_s17   ;;  %s29_s19 = sadd.s32 1, %s805_s16  ;;  %s809_s17 = sphi %s845_s17, %s17_s17   ;;  %s805_s16 = sphi %s843_s16, %s1022_s16   ;;  %s801_s15 = sphi %s841_s15, %s1021_s15   ;;  %s797_s14 = sphi %s839_s14, %s1020_s14   ;;  %s793_s13 = sphi %s837_s13, %s1019_s13   ;;  %s789_s12 = sphi %s835_s12, %s1018_s12  }
   0x6   : > { %p30_p0 = scmp.ge.s32.totalorder %s29_s19, 4  ;;  %s73_s20 = sadd.s32 1, %s797_s14 }
   0x7   : > { %p80_p1 = scmp.ne.s32.totalorder %s797_s14, %s793_s13  ;;  %p81_p2 = scmp.eq.s32.totalorder %s809_s17, 0 }
   0x8   : > { %s1024_s19 = smov (%p30_p0, %s29_s19), 0  ;;  %p86_p4 = scmp.ne.s32.totalorder %s793_s13, %s789_s12 }
   0x9   : > { %p871_p3 = por %p81_p2, %p80_p1  ;;  %s68_s22 = ssub.s32 %s805_s16, %s1024_s19 }
   0xa   : > { %p87_p5 = scmp.eq.s32.totalorder %s562_s18, 0  ;;  %p71_p6 = scmp.eq.s32.totalorder %s68_s22, 0 }
   0xb   : > { %p629_p8 = scmp.lt.s32.totalorder %s809_s17, 4  ;;  %s183_s25 = sand.u32 1, %s797_s14  }
   0xc   : > { %p880_p7 = por %p87_p5, %p86_p4  ;;  %s596_s26 = sshll.u32 %s805_s16, 11 }
   0xd   : > { %s886_s24 = scalar_select %p71_p6, %s797_s14, %s73_s20  }
   0xe   : > { %s566_s27 = sshll.u32 %s183_s25, 7  ;;  %s893_s30 = scalar_lea.hbm %s1011_s1, %s596_s26 }
   0xf   : > { %s187_s4 = scalar_lea.vmem [#allocation2], %s566_s27  ;;  %p897_p9 = pnand %p629_p8, %p871_p3 }
  0x10   : > { %s195_s5 = sshll.u32 %s187_s4, 4  ;;  %s903_s7 = scalar_lea.sflag [#allocation3], %s183_s25  ;;  %s901_s5 = int_to_ptr.vmem [resolvable:$true] %s195_s5 }
  0x11   : > { %s699_s8 = scalar_lea.hbm %s893_s30, 2048  ;;  %p701_p11 = pneg %p897_p9 }
  0x12   : > { %p700_p10 = scmp.ne.s32.totalorder %s893_s30, %s699_s8  ;;  %s704_s11 = scalar_lea.hbm %s1011_s1, 8192 }
  0x13   : > { %p705_p0 = scmp.lt.u32.totalorder %s893_s30, %s1011_s1  ;;  %p706_p1 = scmp.lt.u32.totalorder %s704_s11, %s699_s8 }
  0x14   : > { %p702_p12 = pnand %p701_p11, %p700_p10  ;;  %p708_p3 = scmp.lt.u32.totalorder %s699_s8, %s893_s30 }
  0x15   : > { %p707_p2 = por %p706_p1, %p705_p0 }
  0x16   : > { %p703_p13 = pneg %p702_p12 }
  0x17   : > { %p709_p4 = por %p708_p3, %p707_p2 }
  0x19   : > { %p710_p5 = pnand %p709_p4, %p703_p13 }
  0x1b   : > { %713 = shalt.err (!%p710_p5)
}
  0x1c   : > { %s714_s21 = scalar_lea.vmem %s901_s5, 2048  ;;  %s811_s22 = smov [#allocation2]  }
  0x1d   : > { %p715_p6 = scmp.ne.s32.totalorder %s901_s5, %s714_s21  ;;  %s719_s25 = sshll.u32 %s811_s22, 4  ;;  %s720_s25 = int_to_ptr.vmem [resolvable:$false] %s719_s25 }
  0x1e   : > { %s721_s26 = scalar_lea.vmem %s720_s25, 4096  ;;  %p722_p12 = scmp.lt.s32.totalorder %s901_s5, %s720_s25 }
  0x1f   : > { %p717_p8 = pnand %p715_p6, %p701_p11  ;;  %p723_p0 = scmp.lt.s32.totalorder %s721_s26, %s714_s21 }
  0x21   : > { %p718_p10 = pneg %p717_p8  ;;  %p724_p1 = por %p723_p0, %p722_p12 }
  0x23   : > { %p725_p2 = pnand %p724_p1, %p718_p10 }
  0x25   : > { %728 = shalt.err (!%p725_p2)
}
  0x26   : > { %s812_s27 = smov 64   ;;  %s813_s28 = smov 4  }
  0x27   : > { %628 = dma.hbm_to_vmem [thread:$0]  (!%p897_p9), %s893_s30, 2048, %s901_s5, %s903_s7, %s812_s27, %s812_s27, %s813_s28  }
  0x28   : > { %p569_p11 = scmp.ge.s32.totalorder %s809_s17, 1  ;;  %p203_p13 = scmp.lt.s32.totalorder %s809_s17, 5 }
  0x2a   : > { %p204_p3 = pnand %p569_p11, %p203_p13 }
  0x2b   : > { %s209_s29 = sand.u32 (!%p204_p3), 1, %s793_s13  }
  0x2c   : > { %207 = sbr.rel (%p204_p3) target bundleno = 326 (0x146), region = 32  ;;  %s570_s4 = sshll.u32 (!%p204_p3), %s209_s29, 7 }
  0x2d   : > { %s210_s8 = scalar_lea.sflag (!%p204_p3), [#allocation3], %s209_s29  ;;  %s934_s9 = scalar_lea.vmem (!%p204_p3), [#allocation2], %s570_s4 }
  0x33   : > { %780 = dma.done.wait (%p880_p7), %s210_s8, 2048  }
  0x34   : > { %782 = vsyncadd (%p880_p7), %s210_s8, 4294965248  ;;  %s571_s10 = sshll.u32 %s801_s15, 1  ;;  %p573_p9 = scmp.ne.s32.totalorder %s801_s15, 0 }
  0x35   : > { %p246_p4 = scmp.lt.s32.totalorder %s571_s10, 7  ;;  %v574_v0 = vld [vmem:[%s1012_s2] ss:$0 sm:$0xff] (!%p573_p9) }
  0x36   : > { %261 = sbr.rel (%p573_p9) target bundleno = 61 (0x3d), region = 40  ;;  %269 = vst [vmem:[#allocation5] sm:$0x3] (!%p573_p9), %v574_v0 }
  0x37   : > { %s1026_s10 = smov (!%p246_p4, %s571_s10), 7 }
  0x38   : > { %s572_s30 = sshll.u32 %s1026_s10, 1 }
  0x39   : > { %s251_s7 = scalar_lea.vmem %s1010_s0, %s572_s30 }
  0x3d PF: > { %v683_v1 = vld [vmem:[%s934_s9 + $0x40] sm:$0xff]   ;;  %v685_v3 = vld [vmem:[%s934_s9 + $0x48] sm:$0xff]   ;;  %v687_v5 = vld [vmem:[%s934_s9 + $0x50] sm:$0xff]   ;;  %s814_s15 = smov [#allocation5]   ;;  %p966_p7 = scmp.eq.s32.totalorder %s562_s18, 3 }
  0x3e   : > { %v684_v2 = vld [vmem:[%s934_s9] sm:$0xff]   ;;  %597 = vmatprep.subr.bf16.mxu0 %v683_v1  ;;  %v686_v4 = vld [vmem:[%s934_s9 + $0x8] sm:$0xff]   ;;  %v688_v6 = vld [vmem:[%s934_s9 + $0x10] sm:$0xff]   ;;  %s465_s23 = sshll.u32 %s814_s15, 4  ;;  %s466_s23 = int_to_ptr.vmem [resolvable:$true] %s465_s23 }
  0x3f   : > { %598 = vmatpush3.bf16.msra.mxu0 %v684_v2  ;;  %v689_v7 = vld [vmem:[%s934_s9 + $0x58] sm:$0xff]   ;;  %v691_v9 = vld [vmem:[%s934_s9 + $0x60] sm:$0xff]   ;;  %v693_v11 = vld [vmem:[%s934_s9 + $0x68] sm:$0xff]   ;;  %s729_s21 = scalar_lea.vmem %s466_s23, 32  ;;  %p736_p10 = scmp.lt.s32.totalorder %s466_s23, %s466_s23 }
  0x40   : > { %599 = vmatprep.subr.bf16.mxu0 %v685_v3  ;;  %v690_v8 = vld [vmem:[%s934_s9 + $0x18] sm:$0xff]   ;;  %v692_v10 = vld [vmem:[%s934_s9 + $0x20] sm:$0xff]   ;;  %v694_v14 = vld [vmem:[%s934_s9 + $0x28] sm:$0xff]   ;;  %p730_p5 = scmp.ne.s32.totalorder %s466_s23, %s729_s21  ;;  %p737_p12 = scmp.lt.s32.totalorder %s729_s21, %s729_s21 }
  0x41   : > { %v575_v12 = vld.sshfl [vmem:[%s251_s7] sm:$0x33 pattern:$0x76325410]  ;;  %v695_v16 = vld [vmem:[%s934_s9 + $0x70] sm:$0xff]   ;;  %v697_v18 = vld [vmem:[%s934_s9 + $0x78] sm:$0xff]  }
  0x42   : > { %v280_v13 = vcombine.high %v575_v12, %v575_v12  ;;  %v696_v17 = vld [vmem:[%s934_s9 + $0x30] sm:$0xff]   ;;  %v698_v19 = vld [vmem:[%s934_s9 + $0x38] sm:$0xff]   ;;  %v283_v20 = vpack.c.bf16 %v575_v12, %v575_v12  ;;  %v270_v22 = vld [vmem:[#allocation5] sm:$0x3]  ;;  %p731_p6 = pnand %p730_p5, %p966_p7  ;;  %p738_p0 = por %p737_p12, %p736_p10 }
  0x43   : > { %600 = vmatpush3.bf16.msra.mxu0 %v686_v4 }
  0x44   : > { %601 = vmatprep.subr.bf16.mxu0 %v687_v5  ;;  %v284_v15 = vpack.c.bf16 %v280_v13, %v280_v13  ;;  %p732_p8 = pneg %p731_p6 }
  0x46   : > { %445 = vmatprep.mubr.bf16.mxu0 %v284_v15  ;;  %p739_p1 = pnand %p738_p0, %p732_p8 }
  0x47   : > { %602 = vmatpush3.bf16.msra.mxu0 %v688_v6 }
  0x48   : > { %603 = vmatprep.subr.bf16.mxu0 %v689_v7 }
  0x4b   : > { %604 = vmatpush3.bf16.msra.mxu0 %v690_v8 }
  0x4c   : > { %605 = vmatprep.subr.bf16.mxu0 %v691_v9 }
  0x4f   : > { %606 = vmatpush3.bf16.msra.mxu0 %v692_v10 }
  0x50   : > { %607 = vmatprep.subr.bf16.mxu0 %v693_v11 }
  0x53   : > { %608 = vmatpush3.bf16.msra.mxu0 %v694_v14 }
  0x54   : > { %609 = vmatprep.subr.bf16.mxu0 %v695_v16 }
  0x57   : > { %610 = vmatpush3.bf16.msra.mxu0 %v696_v17 }
  0x58   : > { %611 = vmatprep.subr.bf16.mxu0 %v697_v18 }
  0x5b   : > { %612 = vmatpush3.bf16.msra.mxu0 %v698_v19 }
  0x5e   : > { %446 = vmatmul.mubr.bf16.vlgmr.msra.gmra.mrb[0].mxu0 %v283_v20 }
 0x131   : > { %v613_v21 = vpop.f32.mrb[0].mxu0 }
 0x132   : > { %v614_v23 = vpop.f32.mrb[1].mxu0 }
 0x133   : > { %v615_v24 = vadd.f32 %v614_v23, %v613_v21  ;;  %v616_v25 = vpop.f32.mrb[2].mxu0 }
 0x134   : > { %v617_v26 = vpop.f32.mrb[3].mxu0 }
 0x135   : > { %v453_v27 = vadd.f32 %v615_v24, %v270_v22 }
 0x137   : > { %454 = vst [vmem:[#allocation5] sm:$0x3] %v453_v27 }
 0x138   : > { %742 = shalt.err (!%p739_p1)
}
 0x139   : > { %s743_s18 = scalar_lea.hbm %s1013_s3, 32 }
 0x13a   : > { %p744_p2 = scmp.ne.s32.totalorder %s1013_s3, %s743_s18  ;;  %p749_p3 = scmp.lt.u32.totalorder %s743_s18, %s1013_s3 }
 0x13c   : > { %p745_p11 = pnand %p744_p2, %p966_p7 }
 0x13e   : > { %p746_p13 = pneg %p745_p11 }
 0x140   : > { %p751_p4 = pnand %p749_p3, %p746_p13 }
 0x142   : > { %754 = shalt.err (!%p751_p4)
}
 0x143   : > { %622 = dma.vmem_to_hbm [thread:$0]  (%p966_p7), %s466_s23, 32, %s1013_s3, [#allocation4]  }
 0x144   : > { %784 = dma.done.wait (%p966_p7), [#allocation4], 32  }
 0x145   : > { %786 = vsyncadd (%p966_p7), [#allocation4], 4294967264 }
 0x146 PF: > { %s17_s17 = sadd.s32 1, %s809_s17   ;;  %s1018_s12 = smov %s793_s13 }
 0x147   : > { %p14_p9 = scmp.ge.s32.totalorder %s17_s17, 6   ;;  %s1019_s13 = smov %s797_s14 }
 0x148   : > { %s1020_s14 = smov %s886_s24  ;;  %s1021_s15 = smov %s805_s16 }
 0x149   : > { %s1022_s16 = smov %s1024_s19  ;;  %16 = sbr.rel (!%p14_p9) target bundleno = 5 (0x5), region = 80 }
 0x150   :  { %478 = vsyncpa [#allocation3], 1 }
 0x151   :  { %480 = vsyncpa [#allocation3 + $0x1], 1 }
 0x152   :  { %481 = vsyncpa [#allocation4], 1 }
 0x153   :  { %483 = vsyncpa [#allocation4 + $0x1], 1 }

</bundles_post_ra>
